<compile_context>
chip_gen: v5e
topology: v5e:2x2
jax: 0.10.0
libtpu: 0.0.40
codegen_flags: <defaults>
</compile_context>

<pallas_src>
import functools

import jax
import jax.numpy as jnp
from jax.experimental import pallas as pl
from jax.experimental.pallas import tpu as pltpu

_LANE = 128      # f32 lane width
_SUBLANE = 8     # f32 sublane count


def _round_up(n, m):
    return ((n + m - 1) // m) * m


# ----------------------------------------------------------------------------
# Fused MLP kernel: chains all Linear(+ReLU) layers in one body.
# refs = (x_ref, w0, b0, w1, b1, ..., w_{L-1}, b_{L-1}, o_ref)
# ----------------------------------------------------------------------------
def _fused_mlp_kernel(*refs, num_layers):
    x_ref = refs[0]
    o_ref = refs[-1]
    wb = refs[1:-1]

    x = x_ref[...]                                     # (tile_b, Din_p)
    for i in range(num_layers):
        w = wb[2 * i][...]                             # (Din_p, Dout_p)
        b = wb[2 * i + 1][...]                         # (1, Dout_p)
        x = jnp.dot(x, w, preferred_element_type=jnp.float32) + b
        if i != num_layers - 1:
            x = jnp.maximum(x, 0.0)                    # ReLU (all but last)
    o_ref[...] = x.astype(o_ref.dtype)


# ----------------------------------------------------------------------------
# Parameters: PyTorch-style init, then one-time lane/sublane padding.
# ----------------------------------------------------------------------------
def init_params(key, num_linear_layers, linear_in_dim, linear_hidden_dim,
                linear_out_dim):
    """PyTorch-style Linear init: U(-1/sqrt(fan_in), 1/sqrt(fan_in)).

    Returns unpadded (w, b) pairs with w of shape (fan_in, fan_out).
    """
    dims = []
    for i in range(num_linear_layers):
        if i == 0:
            dims.append((linear_in_dim, linear_hidden_dim))
        elif i == num_linear_layers - 1:
            dims.append((linear_hidden_dim, linear_out_dim))
        else:
            dims.append((linear_hidden_dim, linear_hidden_dim))

    params = []
    for fan_in, fan_out in dims:
        key, kw, kb = jax.random.split(key, 3)
        bound = 1.0 / jnp.sqrt(fan_in)
        w = jax.random.uniform(kw, (fan_in, fan_out), jnp.float32,
                               minval=-bound, maxval=bound)
        b = jax.random.uniform(kb, (fan_out,), jnp.float32,
                               minval=-bound, maxval=bound)
        params.append((w, b))
    return params


def pad_params(params):
    """Zero-pad each layer so every activation dim is a multiple of 128 lanes.

    Biases are stored as (1, d_out_p) once here, not per pallas_call.  Padded
    W rows/cols and padded bias entries are zero, so padded lanes stay exactly
    0 through every layer (ReLU(0) = 0) and the math is unchanged.
    """
    padded = []
    for w, b in params:
        d_in, d_out = w.shape
        d_in_p = _round_up(d_in, _LANE)
        d_out_p = _round_up(d_out, _LANE)
        w_p = jnp.zeros((d_in_p, d_out_p), w.dtype).at[:d_in, :d_out].set(w)
        b_p = jnp.zeros((1, d_out_p), b.dtype).at[0, :d_out].set(b)
        padded.append((w_p, b_p))
    return padded


# ----------------------------------------------------------------------------
# Forward pass matching BlockScalableNFMLinearDecoder.forward.
# ----------------------------------------------------------------------------
def block_scalable_nfm_linear_decoder_forward(padded_params, x, linear_out_dim):
    batch_size = x.shape[0]
    xf = x.reshape(batch_size, -1)                 # torch.flatten(x, start_dim=1)
    d_in = xf.shape[1]
    d_in_p = padded_params[0][0].shape[0]
    d_out_p = padded_params[-1][0].shape[1]
    num_layers = len(padded_params)
    dtype = xf.dtype

    # Batch padding / tiling: sublane-align small batches, 128-row tiles for
    # large batches (fills the MXU, shards across v7x's 2 TensorCores).
    if batch_size <= _LANE:
        tile_b = _round_up(batch_size, _SUBLANE)
        bp = tile_b
    else:
        tile_b = _LANE
        bp = _round_up(batch_size, tile_b)

    x_p = jnp.zeros((bp, d_in_p), dtype).at[:batch_size, :d_in].set(xf)

    flat_inputs = [x_p]
    for w, b in padded_params:
        flat_inputs.extend((w, b))

    kernel = functools.partial(_fused_mlp_kernel, num_layers=num_layers)
    out_shape = jax.ShapeDtypeStruct((bp, d_out_p), dtype)

    n_tiles = bp // tile_b
    if n_tiles == 1:
        # Single shot: no grid, everything resident in VMEM.
        out_p = pl.pallas_call(
            kernel,
            out_shape=out_shape,
            in_specs=[pl.BlockSpec(memory_space=pltpu.MemorySpace.VMEM)]
            * len(flat_inputs),
            out_specs=pl.BlockSpec(memory_space=pltpu.MemorySpace.VMEM),
        )(*flat_inputs)
    else:
        # Batch-tiled: x/output blocked over rows; weights map to block (0, 0)
        # every step so they stay resident across the whole grid.
        in_specs = [pl.BlockSpec((tile_b, d_in_p), lambda i: (i, 0))]
        for w, b in padded_params:
            in_specs.append(pl.BlockSpec(w.shape, lambda i: (0, 0)))
            in_specs.append(pl.BlockSpec(b.shape, lambda i: (0, 0)))
        out_p = pl.pallas_call(
            kernel,
            out_shape=out_shape,
            grid=(n_tiles,),
            in_specs=in_specs,
            out_specs=pl.BlockSpec((tile_b, d_out_p), lambda i: (i, 0)),
            compiler_params=pltpu.CompilerParams(
                dimension_semantics=("parallel",)),
        )(*flat_inputs)

    # Slice away batch/lane padding; matches x.view(batch_size, linear_out_dim).
    return out_p[:batch_size, :linear_out_dim]


# Pure-JAX reference (unpadded params) for correctness checks.
def _reference_forward(params, x, linear_out_dim):
    batch_size = x.shape[0]
    h = x.reshape(batch_size, -1)
    num_layers = len(params)
    for i, (w, b) in enumerate(params):
        h = h @ w + b
        if i != num_layers - 1:
            h = jnp.maximum(h, 0.0)
    return h.reshape(batch_size, linear_out_dim)


if __name__ == "__main__":
    # Small shapes consistent with the module's forward.
    batch, C, H, W = 2, 4, 16, 16
    num_linear_layers = 3
    linear_in_dim = C * H * W            # 1024 (flattened NCHW input)
    linear_hidden_dim = 32
    linear_out_dim = 64

    key = jax.random.PRNGKey(0)
    key, kx = jax.random.split(key)
    x = jax.random.normal(kx, (batch, C, H, W), dtype=jnp.float32)

    params = init_params(key, num_linear_layers, linear_in_dim,
                         linear_hidden_dim, linear_out_dim)
    padded_params = pad_params(params)

    # Small-batch (no-grid, fully fused) path.
    out = block_scalable_nfm_linear_decoder_forward(padded_params, x,
                                                    linear_out_dim)
    out = jax.block_until_ready(out)
    ref = _reference_forward(params, x, linear_out_dim)
    assert out.shape == (batch, linear_out_dim)
    assert jnp.allclose(out, ref, atol=1e-4, rtol=1e-4), "mismatch vs reference"

    # Large-batch (batch-tiled "parallel" grid) path.
    key, kx2 = jax.random.split(key)
    x_big = jax.random.normal(kx2, (200, C, H, W), dtype=jnp.float32)
    out_big = block_scalable_nfm_linear_decoder_forward(padded_params, x_big,
                                                        linear_out_dim)
    out_big = jax.block_until_ready(out_big)
    ref_big = _reference_forward(params, x_big, linear_out_dim)
    assert out_big.shape == (200, linear_out_dim)
    assert jnp.allclose(out_big, ref_big, atol=1e-4, rtol=1e-4), \
        "mismatch vs reference (tiled path)"

    print("KERNEL_OK")
</pallas_src>

<mosaic_0001>
module attributes {stable_mosaic.version = 11 : i64} {
  func.func @_fused_mlp_kernel(%arg0: memref<8x1024xf32, #tpu.memory_space<vmem>>, %arg1: memref<1024x128xf32, #tpu.memory_space<vmem>>, %arg2: memref<1x128xf32, #tpu.memory_space<vmem>>, %arg3: memref<128x128xf32, #tpu.memory_space<vmem>>, %arg4: memref<1x128xf32, #tpu.memory_space<vmem>>, %arg5: memref<128x128xf32, #tpu.memory_space<vmem>>, %arg6: memref<1x128xf32, #tpu.memory_space<vmem>>, %arg7: memref<8x128xf32, #tpu.memory_space<vmem>>) attributes {dimension_semantics = [], scalar_prefetch = 0 : i64, scratch_operands = 0 : i64, tpu.core_type = #tpu.core_type<tc>} {
    %c0 = arith.constant 0 : index
    %c0_0 = arith.constant 0 : index
    %0 = vector.load %arg0[%c0, %c0_0] : memref<8x1024xf32, #tpu.memory_space<vmem>>, vector<8x1024xf32>
    %c0_1 = arith.constant 0 : index
    %c0_2 = arith.constant 0 : index
    %1 = vector.load %arg1[%c0_1, %c0_2] : memref<1024x128xf32, #tpu.memory_space<vmem>>, vector<1024x128xf32>
    %c0_3 = arith.constant 0 : index
    %c0_4 = arith.constant 0 : index
    %2 = vector.load %arg2[%c0_3, %c0_4] : memref<1x128xf32, #tpu.memory_space<vmem>>, vector<1x128xf32>
    %cst = arith.constant dense<0.000000e+00> : vector<8x128xf32>
    %3 = tpu.matmul %0, %1, %cst {dimension_numbers = #tpu.dot_dimension_numbers<[1], [0], [0], [1], [0, 0, 1, 1], [], []>} : vector<8x1024xf32>, vector<1024x128xf32>, vector<8x128xf32> -> vector<8x128xf32>
    %4 = vector.broadcast %2 : vector<1x128xf32> to vector<8x128xf32>
    %5 = arith.addf %3, %4 : vector<8x128xf32>
    %cst_5 = arith.constant 0.000000e+00 : f32
    %6 = vector.broadcast %cst_5 : f32 to vector<8x128xf32>
    %7 = arith.maximumf %5, %6 : vector<8x128xf32>
    %c0_6 = arith.constant 0 : index
    %c0_7 = arith.constant 0 : index
    %8 = vector.load %arg3[%c0_6, %c0_7] : memref<128x128xf32, #tpu.memory_space<vmem>>, vector<128x128xf32>
    %c0_8 = arith.constant 0 : index
    %c0_9 = arith.constant 0 : index
    %9 = vector.load %arg4[%c0_8, %c0_9] : memref<1x128xf32, #tpu.memory_space<vmem>>, vector<1x128xf32>
    %cst_10 = arith.constant dense<0.000000e+00> : vector<8x128xf32>
    %10 = tpu.matmul %7, %8, %cst_10 {dimension_numbers = #tpu.dot_dimension_numbers<[1], [0], [0], [1], [0, 0, 1, 1], [], []>} : vector<8x128xf32>, vector<128x128xf32>, vector<8x128xf32> -> vector<8x128xf32>
    %11 = vector.broadcast %9 : vector<1x128xf32> to vector<8x128xf32>
    %12 = arith.addf %10, %11 : vector<8x128xf32>
    %cst_11 = arith.constant 0.000000e+00 : f32
    %13 = vector.broadcast %cst_11 : f32 to vector<8x128xf32>
    %14 = arith.maximumf %12, %13 : vector<8x128xf32>
    %c0_12 = arith.constant 0 : index
    %c0_13 = arith.constant 0 : index
    %15 = vector.load %arg5[%c0_12, %c0_13] : memref<128x128xf32, #tpu.memory_space<vmem>>, vector<128x128xf32>
    %c0_14 = arith.constant 0 : index
    %c0_15 = arith.constant 0 : index
    %16 = vector.load %arg6[%c0_14, %c0_15] : memref<1x128xf32, #tpu.memory_space<vmem>>, vector<1x128xf32>
    %cst_16 = arith.constant dense<0.000000e+00> : vector<8x128xf32>
    %17 = tpu.matmul %14, %15, %cst_16 {dimension_numbers = #tpu.dot_dimension_numbers<[1], [0], [0], [1], [0, 0, 1, 1], [], []>} : vector<8x128xf32>, vector<128x128xf32>, vector<8x128xf32> -> vector<8x128xf32>
    %18 = vector.broadcast %16 : vector<1x128xf32> to vector<8x128xf32>
    %19 = arith.addf %17, %18 : vector<8x128xf32>
    %c0_17 = arith.constant 0 : index
    %c0_18 = arith.constant 0 : index
    %20 = vector.load %arg7[%c0_17, %c0_18] : memref<8x128xf32, #tpu.memory_space<vmem>>, vector<8x128xf32>
    tpu.vector_store %arg7[%c0_17, %c0_18], %19 {strides = array<i32>} : memref<8x128xf32, #tpu.memory_space<vmem>>, vector<8x128xf32>,
    return
  }
}

</mosaic_0001>

<bundles_post_ra>
// kernel: tpu_custom_call.1
= control target key start
LH: loop header
LB: loop body
LE: loop exit
PB: predicated region body
PF: predicated region fallthrough
CT: control target
= control target key end

     0   :  { %12 = vsyncpa [#allocation3], 0  ;;  %s699_s0 = inlined_call_operand.hbm [shape: f32[8,1024], index: 0, kind: input, shape index: {}]   ;;  %s700_s1 = inlined_call_operand.hbm [shape: f32[1024,128], index: 1, kind: input, shape index: {}]   ;;  %s701_s2 = inlined_call_operand.vmem [shape: f32[1,128], index: 2, kind: input, shape index: {}]   ;;  %s702_s3 = inlined_call_operand.hbm [shape: f32[128,128], index: 3, kind: input, shape index: {}]   ;;  %s703_s4 = inlined_call_operand.vmem [shape: f32[1,128], index: 4, kind: input, shape index: {}]   ;;  %s704_s5 = inlined_call_operand.hbm [shape: f32[128,128], index: 5, kind: input, shape index: {}]   ;;  %s705_s6 = inlined_call_operand.vmem [shape: f32[1,128], index: 6, kind: input, shape index: {}]   ;;  %s706_s7 = inlined_call_operand.hbm [shape: f32[8,128], index: 7, kind: output, shape index: {}]  }
   0x1   :  { %13 = vsyncpa [#allocation6], 0 }
   0x2   :  { %14 = vsyncpa [#allocation9], 0  ;;  %s31_s26 = sshll.u32 %s700_s1, 4  ;;  %s32_s26 = int_to_ptr.hbm [resolvable:$true] %s31_s26 }
   0x3   :  { %15 = vsyncpa [#allocation4], 0  ;;  %s628_s27 = smov [#allocation5]   ;;  %s21_s8 = sshll.u32 %s699_s0, 4  ;;  %s22_s8 = int_to_ptr.hbm [resolvable:$true] %s21_s8 }
   0x4   :  { %s33_s28 = sshll.u32 %s628_s27, 4  ;;  %s629_s9 = smov 128   ;;  %s34_s28 = int_to_ptr.vmem [resolvable:$true] %s33_s28 }
   0x5   :  { %s630_s10 = smov 8   ;;  %s631_s11 = smov [#allocation2]  }
   0x6   :  { %39 = dma.hbm_to_vmem [thread:$0]  %s32_s26, 16384, %s34_s28, [#allocation6], %s629_s9, %s629_s9, %s630_s10  }
   0x7   :  { %s23_s12 = sshll.u32 %s631_s11, 4  ;;  %s46_s15 = sshll.u32 %s702_s3, 4  ;;  %s24_s12 = int_to_ptr.vmem [resolvable:$true] %s23_s12  ;;  %s47_s15 = int_to_ptr.hbm [resolvable:$true] %s46_s15 }
   0x8   :  { %26 = dma.hbm_to_vmem [thread:$0]  %s22_s8, 1024, %s24_s12, [#allocation3]  }
   0x9   :  { %s61_s17 = sshll.u32 %s704_s5, 4  ;;  %s632_s18 = smov [#allocation7]   ;;  %s62_s17 = int_to_ptr.hbm [resolvable:$true] %s61_s17 }
   0xa   :  { %s48_s19 = sshll.u32 %s632_s18, 4  ;;  %s633_s0 = smov [#allocation8]   ;;  %s49_s19 = int_to_ptr.vmem [resolvable:$true] %s48_s19 }
   0xb   :  { %54 = dma.hbm_to_vmem [thread:$0]  %s47_s15, 2048, %s49_s19, [#allocation6], %s629_s9, %s629_s9, %s630_s10  }
   0xc   :  { %s63_s20 = sshll.u32 %s633_s0, 4  ;;  %s64_s20 = int_to_ptr.vmem [resolvable:$true] %s63_s20 }
   0xd   :  { %69 = dma.hbm_to_vmem [thread:$0]  %s62_s17, 2048, %s64_s20, [#allocation9], %s629_s9, %s629_s9, %s630_s10  }
   0xe   :  { %620 = dma.done.wait [#allocation3], 1024  }
   0xf   :  { %621 = vsyncadd [#allocation3], 4294966272 }
  0x10   :  { %622 = dma.done.wait [#allocation6], 18432  }
  0x11   :  { %623 = vsyncadd [#allocation6], 4294948864 }
  0x12   :  { %624 = dma.done.wait [#allocation9], 2048  }
  0x13   :  { %625 = vsyncadd [#allocation9], 4294965248  ;;  %v143_v0 = vld [vmem:[#allocation5 + $0x178] sm:$0xff]  ;;  %v142_v2 = vld [vmem:[#allocation5 + $0x170] sm:$0xff]  ;;  %s634_s24 = smov [#allocation10]   ;;  %s478_s28 = sshll.u32 %s706_s7, 4  ;;  %s479_s28 = int_to_ptr.hbm [resolvable:$true] %s478_s28 }
  0x14   :  { %v111_v1 = vld [vmem:[#allocation5 + $0x78] sm:$0xff]  ;;  %268 = vmatpush.msra.mxu2 %v143_v0  ;;  %v110_v4 = vld [vmem:[#allocation5 + $0x70] sm:$0xff]  ;;  %v141_v6 = vld [vmem:[#allocation5 + $0x168] sm:$0xff]  ;;  %s476_s25 = sshll.u32 %s634_s24, 4  ;;  %s477_s25 = int_to_ptr.vmem [resolvable:$true] %s476_s25 }
  0x15   :  { %228 = vmatpush.msra.mxu0 %v111_v1  ;;  %v159_v3 = vld [vmem:[#allocation5 + $0x1f8] sm:$0xff]  ;;  %v158_v7 = vld [vmem:[#allocation5 + $0x1f0] sm:$0xff]  ;;  %v109_v8 = vld [vmem:[#allocation5 + $0x68] sm:$0xff] }
  0x16   :  { %v127_v5 = vld [vmem:[#allocation5 + $0xf8] sm:$0xff]  ;;  %288 = vmatpush.msra.mxu3 %v159_v3  ;;  %269 = vmatpush.msra.mxu2 %v142_v2  ;;  %v126_v9 = vld [vmem:[#allocation5 + $0xf0] sm:$0xff]  ;;  %v157_v10 = vld [vmem:[#allocation5 + $0x1e8] sm:$0xff] }
  0x17   :  { %248 = vmatpush.msra.mxu1 %v127_v5  ;;  %229 = vmatpush.msra.mxu0 %v110_v4  ;;  %v140_v11 = vld [vmem:[#allocation5 + $0x160] sm:$0xff]  ;;  %v125_v13 = vld [vmem:[#allocation5 + $0xe8] sm:$0xff]  ;;  %v139_v16 = vld [vmem:[#allocation5 + $0x158] sm:$0xff] }
  0x18   :  { %289 = vmatpush.msra.mxu3 %v158_v7  ;;  %v108_v12 = vld [vmem:[#allocation5 + $0x60] sm:$0xff]  ;;  %270 = vmatpush.msra.mxu2 %v141_v6  ;;  %v107_v17 = vld [vmem:[#allocation5 + $0x58] sm:$0xff]  ;;  %v138_v20 = vld [vmem:[#allocation5 + $0x150] sm:$0xff] }
  0x19   :  { %249 = vmatpush.msra.mxu1 %v126_v9  ;;  %230 = vmatpush.msra.mxu0 %v109_v8  ;;  %v156_v14 = vld [vmem:[#allocation5 + $0x1e0] sm:$0xff]  ;;  %v155_v18 = vld [vmem:[#allocation5 + $0x1d8] sm:$0xff]  ;;  %v106_v21 = vld [vmem:[#allocation5 + $0x50] sm:$0xff] }
  0x1a   :  { %v124_v15 = vld [vmem:[#allocation5 + $0xe0] sm:$0xff]  ;;  %290 = vmatpush.msra.mxu3 %v157_v10  ;;  %271 = vmatpush.msra.mxu2 %v140_v11  ;;  %v123_v19 = vld [vmem:[#allocation5 + $0xd8] sm:$0xff]  ;;  %v154_v22 = vld [vmem:[#allocation5 + $0x1d0] sm:$0xff] }
  0x1b   :  { %250 = vmatpush.msra.mxu1 %v125_v13  ;;  %231 = vmatpush.msra.mxu0 %v108_v12  ;;  %v122_v23 = vld [vmem:[#allocation5 + $0xd0] sm:$0xff]  ;;  %v137_v24 = vld [vmem:[#allocation5 + $0x148] sm:$0xff]  ;;  %v136_v28 = vld [vmem:[#allocation5 + $0x140] sm:$0xff] }
  0x1c   :  { %291 = vmatpush.msra.mxu3 %v156_v14  ;;  %272 = vmatpush.msra.mxu2 %v139_v16  ;;  %v105_v25 = vld [vmem:[#allocation5 + $0x48] sm:$0xff]  ;;  %v104_v29 = vld [vmem:[#allocation5 + $0x40] sm:$0xff]  ;;  %v135_v32 = vld [vmem:[#allocation5 + $0x138] sm:$0xff] }
  0x1d   :  { %251 = vmatpush.msra.mxu1 %v124_v15  ;;  %232 = vmatpush.msra.mxu0 %v107_v17  ;;  %v153_v26 = vld [vmem:[#allocation5 + $0x1c8] sm:$0xff]  ;;  %v152_v30 = vld [vmem:[#allocation5 + $0x1c0] sm:$0xff]  ;;  %v103_v33 = vld [vmem:[#allocation5 + $0x38] sm:$0xff] }
  0x1e   :  { %292 = vmatpush.msra.mxu3 %v155_v18  ;;  %273 = vmatpush.msra.mxu2 %v138_v20  ;;  %v121_v27 = vld [vmem:[#allocation5 + $0xc8] sm:$0xff]  ;;  %v120_v31 = vld [vmem:[#allocation5 + $0xc0] sm:$0xff]  ;;  %v151_v34 = vld [vmem:[#allocation5 + $0x1b8] sm:$0xff] }
  0x1f   :  { %252 = vmatpush.msra.mxu1 %v123_v19  ;;  %233 = vmatpush.msra.mxu0 %v106_v21  ;;  %v119_v35 = vld [vmem:[#allocation5 + $0xb8] sm:$0xff]  ;;  %v134_v36 = vld [vmem:[#allocation5 + $0x130] sm:$0xff]  ;;  %v133_v40 = vld [vmem:[#allocation5 + $0x128] sm:$0xff] }
  0x20   :  { %293 = vmatpush.msra.mxu3 %v154_v22  ;;  %274 = vmatpush.msra.mxu2 %v137_v24  ;;  %v102_v37 = vld [vmem:[#allocation5 + $0x30] sm:$0xff]  ;;  %v101_v41 = vld [vmem:[#allocation5 + $0x28] sm:$0xff]  ;;  %v132_v44 = vld [vmem:[#allocation5 + $0x120] sm:$0xff] }
  0x21   :  { %253 = vmatpush.msra.mxu1 %v122_v23  ;;  %234 = vmatpush.msra.mxu0 %v105_v25  ;;  %v150_v38 = vld [vmem:[#allocation5 + $0x1b0] sm:$0xff]  ;;  %v149_v42 = vld [vmem:[#allocation5 + $0x1a8] sm:$0xff]  ;;  %v100_v45 = vld [vmem:[#allocation5 + $0x20] sm:$0xff] }
  0x22   :  { %294 = vmatpush.msra.mxu3 %v153_v26  ;;  %275 = vmatpush.msra.mxu2 %v136_v28  ;;  %v118_v39 = vld [vmem:[#allocation5 + $0xb0] sm:$0xff]  ;;  %v117_v43 = vld [vmem:[#allocation5 + $0xa8] sm:$0xff]  ;;  %v148_v46 = vld [vmem:[#allocation5 + $0x1a0] sm:$0xff] }
  0x23   :  { %254 = vmatpush.msra.mxu1 %v121_v27  ;;  %235 = vmatpush.msra.mxu0 %v104_v29  ;;  %v116_v47 = vld [vmem:[#allocation5 + $0xa0] sm:$0xff]  ;;  %v131_v48 = vld [vmem:[#allocation5 + $0x118] sm:$0xff]  ;;  %v130_v52 = vld [vmem:[#allocation5 + $0x110] sm:$0xff] }
  0x24   :  { %295 = vmatpush.msra.mxu3 %v152_v30  ;;  %276 = vmatpush.msra.mxu2 %v135_v32  ;;  %v99_v49 = vld [vmem:[#allocation5 + $0x18] sm:$0xff]  ;;  %v98_v53 = vld [vmem:[#allocation5 + $0x10] sm:$0xff]  ;;  %v129_v56 = vld [vmem:[#allocation5 + $0x108] sm:$0xff] }
  0x25   :  { %255 = vmatpush.msra.mxu1 %v120_v31  ;;  %236 = vmatpush.msra.mxu0 %v103_v33  ;;  %v147_v50 = vld [vmem:[#allocation5 + $0x198] sm:$0xff]  ;;  %v146_v54 = vld [vmem:[#allocation5 + $0x190] sm:$0xff]  ;;  %v97_v57 = vld [vmem:[#allocation5 + $0x8] sm:$0xff] }
  0x26   :  { %296 = vmatpush.msra.mxu3 %v151_v34  ;;  %277 = vmatpush.msra.mxu2 %v134_v36  ;;  %v115_v51 = vld [vmem:[#allocation5 + $0x98] sm:$0xff]  ;;  %v114_v55 = vld [vmem:[#allocation5 + $0x90] sm:$0xff]  ;;  %v145_v58 = vld [vmem:[#allocation5 + $0x188] sm:$0xff] }
  0x27   :  { %256 = vmatpush.msra.mxu1 %v119_v35  ;;  %237 = vmatpush.msra.mxu0 %v102_v37  ;;  %v113_v59 = vld [vmem:[#allocation5 + $0x88] sm:$0xff]  ;;  %v128_v60 = vld [vmem:[#allocation5 + $0x100] sm:$0xff]  ;;  %v207_v62 = vld [vmem:[#allocation5 + $0x378] sm:$0xff] }
  0x28   :  { %297 = vmatpush.msra.mxu3 %v150_v38  ;;  %278 = vmatpush.msra.mxu2 %v133_v40  ;;  %v96_v61 = vld [vmem:[#allocation5] sm:$0xff]  ;;  %v175_v0 = vld [vmem:[#allocation5 + $0x278] sm:$0xff]  ;;  %v206_v2 = vld [vmem:[#allocation5 + $0x370] sm:$0xff] }
  0x29   :  { %257 = vmatpush.msra.mxu1 %v118_v39  ;;  %238 = vmatpush.msra.mxu0 %v101_v41  ;;  %v144_v63 = vld [vmem:[#allocation5 + $0x180] sm:$0xff]  ;;  %v223_v1 = vld [vmem:[#allocation5 + $0x3f8] sm:$0xff]  ;;  %v174_v4 = vld [vmem:[#allocation5 + $0x270] sm:$0xff] }
  0x2a   :  { %298 = vmatpush.msra.mxu3 %v149_v42  ;;  %279 = vmatpush.msra.mxu2 %v132_v44  ;;  %v112_v3 = vld [vmem:[#allocation5 + $0x80] sm:$0xff]  ;;  %v191_v5 = vld [vmem:[#allocation5 + $0x2f8] sm:$0xff]  ;;  %v205_v6 = vld [vmem:[#allocation5 + $0x368] sm:$0xff] }
  0x2b   :  { %258 = vmatpush.msra.mxu1 %v117_v43  ;;  %239 = vmatpush.msra.mxu0 %v100_v45  ;;  %v222_v7 = vld [vmem:[#allocation5 + $0x3f0] sm:$0xff]  ;;  %v173_v8 = vld [vmem:[#allocation5 + $0x268] sm:$0xff]  ;;  %v204_v10 = vld [vmem:[#allocation5 + $0x360] sm:$0xff] }
  0x2c   :  { %299 = vmatpush.msra.mxu3 %v148_v46  ;;  %280 = vmatpush.msra.mxu2 %v131_v48  ;;  %v190_v9 = vld [vmem:[#allocation5 + $0x2f0] sm:$0xff]  ;;  %v221_v11 = vld [vmem:[#allocation5 + $0x3e8] sm:$0xff]  ;;  %v172_v12 = vld [vmem:[#allocation5 + $0x260] sm:$0xff] }
  0x2d   :  { %259 = vmatpush.msra.mxu1 %v116_v47  ;;  %240 = vmatpush.msra.mxu0 %v99_v49  ;;  %v189_v13 = vld [vmem:[#allocation5 + $0x2e8] sm:$0xff]  ;;  %v203_v14 = vld [vmem:[#allocation5 + $0x358] sm:$0xff]  ;;  %v220_v15 = vld [vmem:[#allocation5 + $0x3e0] sm:$0xff] }
  0x2e   :  { %300 = vmatpush.msra.mxu3 %v147_v50  ;;  %281 = vmatpush.msra.mxu2 %v130_v52  ;;  %v171_v16 = vld [vmem:[#allocation5 + $0x258] sm:$0xff]  ;;  %v188_v17 = vld [vmem:[#allocation5 + $0x2e0] sm:$0xff]  ;;  %v202_v18 = vld [vmem:[#allocation5 + $0x350] sm:$0xff] }
  0x2f   :  { %260 = vmatpush.msra.mxu1 %v115_v51  ;;  %241 = vmatpush.msra.mxu0 %v98_v53  ;;  %v219_v19 = vld [vmem:[#allocation5 + $0x3d8] sm:$0xff]  ;;  %v170_v20 = vld [vmem:[#allocation5 + $0x250] sm:$0xff]  ;;  %v201_v22 = vld [vmem:[#allocation5 + $0x348] sm:$0xff] }
  0x30   :  { %301 = vmatpush.msra.mxu3 %v146_v54  ;;  %282 = vmatpush.msra.mxu2 %v129_v56  ;;  %v187_v21 = vld [vmem:[#allocation5 + $0x2d8] sm:$0xff]  ;;  %v218_v23 = vld [vmem:[#allocation5 + $0x3d0] sm:$0xff]  ;;  %v169_v24 = vld [vmem:[#allocation5 + $0x248] sm:$0xff] }
  0x31   :  { %261 = vmatpush.msra.mxu1 %v114_v55  ;;  %242 = vmatpush.msra.mxu0 %v97_v57  ;;  %v186_v25 = vld [vmem:[#allocation5 + $0x2d0] sm:$0xff]  ;;  %v200_v26 = vld [vmem:[#allocation5 + $0x340] sm:$0xff]  ;;  %v217_v27 = vld [vmem:[#allocation5 + $0x3c8] sm:$0xff] }
  0x32   :  { %302 = vmatpush.msra.mxu3 %v145_v58  ;;  %283 = vmatpush.msra.mxu2 %v128_v60  ;;  %v168_v28 = vld [vmem:[#allocation5 + $0x240] sm:$0xff]  ;;  %v185_v29 = vld [vmem:[#allocation5 + $0x2c8] sm:$0xff]  ;;  %v199_v30 = vld [vmem:[#allocation5 + $0x338] sm:$0xff] }
  0x33   :  { %262 = vmatpush.msra.mxu1 %v113_v59  ;;  %243 = vmatpush.msra.mxu0 %v96_v61  ;;  %v216_v31 = vld [vmem:[#allocation5 + $0x3c0] sm:$0xff]  ;;  %v167_v32 = vld [vmem:[#allocation5 + $0x238] sm:$0xff]  ;;  %v198_v34 = vld [vmem:[#allocation5 + $0x330] sm:$0xff] }
  0x34   :  { %348 = vmatpush.msrb.mxu2 %v207_v62  ;;  %303 = vmatpush.msra.mxu3 %v144_v63  ;;  %v184_v33 = vld [vmem:[#allocation5 + $0x2c0] sm:$0xff]  ;;  %v215_v35 = vld [vmem:[#allocation5 + $0x3b8] sm:$0xff]  ;;  %v166_v36 = vld [vmem:[#allocation5 + $0x230] sm:$0xff] }
  0x35   :  { %308 = vmatpush.msrb.mxu0 %v175_v0  ;;  %263 = vmatpush.msra.mxu1 %v112_v3  ;;  %v183_v37 = vld [vmem:[#allocation5 + $0x2b8] sm:$0xff]  ;;  %v197_v38 = vld [vmem:[#allocation5 + $0x328] sm:$0xff]  ;;  %v214_v39 = vld [vmem:[#allocation5 + $0x3b0] sm:$0xff] }
  0x36   :  { %368 = vmatpush.msrb.mxu3 %v223_v1  ;;  %349 = vmatpush.msrb.mxu2 %v206_v2  ;;  %v165_v40 = vld [vmem:[#allocation5 + $0x228] sm:$0xff]  ;;  %v182_v41 = vld [vmem:[#allocation5 + $0x2b0] sm:$0xff]  ;;  %v196_v42 = vld [vmem:[#allocation5 + $0x320] sm:$0xff] }
  0x37   :  { %309 = vmatpush.msrb.mxu0 %v174_v4  ;;  %328 = vmatpush.msrb.mxu1 %v191_v5  ;;  %v213_v43 = vld [vmem:[#allocation5 + $0x3a8] sm:$0xff]  ;;  %v90_v44 = vld [vmem:[#allocation2 + $0x10] sm:$0xff]  ;;  %v164_v45 = vld [vmem:[#allocation5 + $0x220] sm:$0xff] }
  0x38   :  { %350 = vmatpush.msrb.mxu2 %v205_v6  ;;  %369 = vmatpush.msrb.mxu3 %v222_v7  ;;  %v181_v46 = vld [vmem:[#allocation5 + $0x2a8] sm:$0xff]  ;;  %v195_v47 = vld [vmem:[#allocation5 + $0x318] sm:$0xff]  ;;  %v212_v48 = vld [vmem:[#allocation5 + $0x3a0] sm:$0xff] }
  0x39   :  { %310 = vmatpush.msrb.mxu0 %v173_v8  ;;  %329 = vmatpush.msrb.mxu1 %v190_v9  ;;  %v88_v49 = vld [vmem:[#allocation2] sm:$0xff]  ;;  %v91_v50 = vld [vmem:[#allocation2 + $0x18] sm:$0xff]  ;;  %v194_v53 = vld [vmem:[#allocation5 + $0x310] sm:$0xff] }
  0x3a   :  { %351 = vmatpush.msrb.mxu2 %v204_v10  ;;  %370 = vmatpush.msrb.mxu3 %v221_v11  ;;  %v163_v51 = vld [vmem:[#allocation5 + $0x218] sm:$0xff]  ;;  %v180_v52 = vld [vmem:[#allocation5 + $0x2a0] sm:$0xff]  ;;  %v89_v55 = vld [vmem:[#allocation2 + $0x8] sm:$0xff] }
  0x3b   :  { %311 = vmatpush.msrb.mxu0 %v172_v12  ;;  %330 = vmatpush.msrb.mxu1 %v189_v13  ;;  %v211_v54 = vld [vmem:[#allocation5 + $0x398] sm:$0xff]  ;;  %v162_v56 = vld [vmem:[#allocation5 + $0x210] sm:$0xff]  ;;  %v193_v58 = vld [vmem:[#allocation5 + $0x308] sm:$0xff] }
  0x3c   :  { %352 = vmatpush.msrb.mxu2 %v203_v14  ;;  %371 = vmatpush.msrb.mxu3 %v220_v15  ;;  %v179_v57 = vld [vmem:[#allocation5 + $0x298] sm:$0xff]  ;;  %v210_v59 = vld [vmem:[#allocation5 + $0x390] sm:$0xff]  ;;  %v161_v60 = vld [vmem:[#allocation5 + $0x208] sm:$0xff] }
  0x3d   :  { %312 = vmatpush.msrb.mxu0 %v171_v16  ;;  %331 = vmatpush.msrb.mxu1 %v188_v17  ;;  %v178_v61 = vld [vmem:[#allocation5 + $0x290] sm:$0xff]  ;;  %v192_v62 = vld [vmem:[#allocation5 + $0x300] sm:$0xff]  ;;  %v209_v63 = vld [vmem:[#allocation5 + $0x388] sm:$0xff] }
  0x3e   :  { %353 = vmatpush.msrb.mxu2 %v202_v18  ;;  %372 = vmatpush.msrb.mxu3 %v219_v19  ;;  %v94_v0 = vld [vmem:[#allocation2 + $0x30] sm:$0xff]  ;;  %v160_v1 = vld [vmem:[#allocation5 + $0x200] sm:$0xff]  ;;  %v177_v2 = vld [vmem:[#allocation5 + $0x288] sm:$0xff] }
  0x3f   :  { %313 = vmatpush.msrb.mxu0 %v170_v20  ;;  %332 = vmatpush.msrb.mxu1 %v187_v21  ;;  %v208_v3 = vld [vmem:[#allocation5 + $0x380] sm:$0xff]  ;;  %v95_v5 = vld [vmem:[#allocation2 + $0x38] sm:$0xff]  ;;  %v93_v8 = vld [vmem:[#allocation2 + $0x28] sm:$0xff] }
  0x40   :  { %354 = vmatpush.msrb.mxu2 %v201_v22  ;;  %373 = vmatpush.msrb.mxu3 %v218_v23  ;;  %v92_v4 = vld [vmem:[#allocation2 + $0x20] sm:$0xff]  ;;  %v404_v7 = vld [vmem:[#allocation7 + $0x78] sm:$0xff]  ;;  %v403_v9 = vld [vmem:[#allocation7 + $0x70] sm:$0xff] }
  0x41   :  { %314 = vmatpush.msrb.mxu0 %v169_v24  ;;  %333 = vmatpush.msrb.mxu1 %v186_v25  ;;  %v176_v6 = vld [vmem:[#allocation5 + $0x280] sm:$0xff]  ;;  %v402_v10 = vld [vmem:[#allocation7 + $0x68] sm:$0xff]  ;;  %v400_v12 = vld [vmem:[#allocation7 + $0x58] sm:$0xff] }
  0x42   :  { %355 = vmatpush.msrb.mxu2 %v200_v26  ;;  %374 = vmatpush.msrb.mxu3 %v217_v27  ;;  %v401_v11 = vld [vmem:[#allocation7 + $0x60] sm:$0xff]  ;;  %v399_v13 = vld [vmem:[#allocation7 + $0x50] sm:$0xff]  ;;  %v398_v14 = vld [vmem:[#allocation7 + $0x48] sm:$0xff] }
  0x43   :  { %315 = vmatpush.msrb.mxu0 %v168_v28  ;;  %334 = vmatpush.msrb.mxu1 %v185_v29  ;;  %v397_v15 = vld [vmem:[#allocation7 + $0x40] sm:$0xff]  ;;  %v396_v16 = vld [vmem:[#allocation7 + $0x38] sm:$0xff]  ;;  %v395_v17 = vld [vmem:[#allocation7 + $0x30] sm:$0xff] }
  0x44   :  { %356 = vmatpush.msrb.mxu2 %v199_v30  ;;  %375 = vmatpush.msrb.mxu3 %v216_v31  ;;  %v394_v18 = vld [vmem:[#allocation7 + $0x28] sm:$0xff]  ;;  %v393_v19 = vld [vmem:[#allocation7 + $0x20] sm:$0xff]  ;;  %v392_v20 = vld [vmem:[#allocation7 + $0x18] sm:$0xff] }
  0x45   :  { %316 = vmatpush.msrb.mxu0 %v167_v32  ;;  %335 = vmatpush.msrb.mxu1 %v184_v33  ;;  %v391_v21 = vld [vmem:[#allocation7 + $0x10] sm:$0xff]  ;;  %v390_v22 = vld [vmem:[#allocation7 + $0x8] sm:$0xff]  ;;  %v389_v23 = vld [vmem:[#allocation7] sm:$0xff] }
  0x46   :  { %357 = vmatpush.msrb.mxu2 %v198_v34  ;;  %376 = vmatpush.msrb.mxu3 %v215_v35  ;;  %v445_v24 = vld [vmem:[#allocation8 + $0x78] sm:$0xff]  ;;  %v444_v25 = vld [vmem:[#allocation8 + $0x70] sm:$0xff]  ;;  %v443_v26 = vld [vmem:[#allocation8 + $0x68] sm:$0xff] }
  0x47   :  { %317 = vmatpush.msrb.mxu0 %v166_v36  ;;  %336 = vmatpush.msrb.mxu1 %v183_v37  ;;  %v442_v27 = vld [vmem:[#allocation8 + $0x60] sm:$0xff]  ;;  %v441_v28 = vld [vmem:[#allocation8 + $0x58] sm:$0xff]  ;;  %v440_v30 = vld [vmem:[#allocation8 + $0x50] sm:$0xff] }
  0x48   :  { %358 = vmatpush.msrb.mxu2 %v197_v38  ;;  %377 = vmatpush.msrb.mxu3 %v214_v39  ;;  %v497_v29 = vld [vmem:[%s701_s2] ss:$0 sm:$0xff]  ;;  %v439_v31 = vld [vmem:[#allocation8 + $0x48] sm:$0xff]  ;;  %v437_v36 = vld [vmem:[#allocation8 + $0x38] sm:$0xff] }
  0x49   :  { %318 = vmatpush.msrb.mxu0 %v165_v40  ;;  %337 = vmatpush.msrb.mxu1 %v182_v41  ;;  %v438_v34 = vld [vmem:[#allocation8 + $0x40] sm:$0xff]  ;;  %v436_v39 = vld [vmem:[#allocation8 + $0x30] sm:$0xff] }
  0x4a   :  { %359 = vmatpush.msrb.mxu2 %v196_v42  ;;  %378 = vmatpush.msrb.mxu3 %v213_v43  ;;  %v435_v42 = vld [vmem:[#allocation8 + $0x28] sm:$0xff] }
  0x4b   :  { %284 = vmatmul.f32.vlgmr.msra.gmra.mxu2 %v90_v44  ;;  %319 = vmatpush.msrb.mxu0 %v164_v45  ;;  %v434_v44 = vld [vmem:[#allocation8 + $0x20] sm:$0xff] }
  0x4c   :  { %338 = vmatpush.msrb.mxu1 %v181_v46  ;;  %360 = vmatpush.msrb.mxu2 %v195_v47  ;;  %v433_v47 = vld [vmem:[#allocation8 + $0x18] sm:$0xff] }
  0x4d   :  { %379 = vmatpush.msrb.mxu3 %v212_v48  ;;  %244 = vmatmul.f32.vlgmr.msra.gmra.mxu0 %v88_v49 }
  0x4e   :  { %304 = vmatmul.f32.vlgmr.msra.gmra.mxu3 %v91_v50  ;;  %320 = vmatpush.msrb.mxu0 %v163_v51 }
  0x4f   :  { %339 = vmatpush.msrb.mxu1 %v180_v52  ;;  %361 = vmatpush.msrb.mxu2 %v194_v53 }
  0x50   :  { %380 = vmatpush.msrb.mxu3 %v211_v54  ;;  %264 = vmatmul.f32.vlgmr.msra.gmra.mxu1 %v89_v55  ;;  %v432_v55 = vld [vmem:[#allocation8 + $0x10] sm:$0xff] }
  0x51   :  { %321 = vmatpush.msrb.mxu0 %v162_v56  ;;  %340 = vmatpush.msrb.mxu1 %v179_v57  ;;  %v431_v56 = vld [vmem:[#allocation8 + $0x8] sm:$0xff]  ;;  %v430_v57 = vld [vmem:[#allocation8] sm:$0xff] }
  0x52   :  { %362 = vmatpush.msrb.mxu2 %v193_v58  ;;  %381 = vmatpush.msrb.mxu3 %v210_v59  ;;  %v498_v58 = vld [vmem:[%s703_s4] ss:$0 sm:$0xff] }
  0x53   :  { %322 = vmatpush.msrb.mxu0 %v161_v60  ;;  %341 = vmatpush.msrb.mxu1 %v178_v61 }
  0x54   :  { %363 = vmatpush.msrb.mxu2 %v192_v62  ;;  %382 = vmatpush.msrb.mxu3 %v209_v63  ;;  %v499_v62 = vld [vmem:[%s705_s6] ss:$0 sm:$0xff] }
  0x55   :  { %364 = vmatmul.f32.vlgmr.msrb.gmra.mxu2 %v94_v0  ;;  %323 = vmatpush.msrb.mxu0 %v160_v1 }
  0x56   :  { %342 = vmatpush.msrb.mxu1 %v177_v2  ;;  %383 = vmatpush.msrb.mxu3 %v208_v3 }
  0x57   :  { %324 = vmatmul.f32.vlgmr.msrb.gmra.mxu0 %v92_v4  ;;  %384 = vmatmul.f32.vlgmr.msrb.gmra.mxu3 %v95_v5 }
  0x58   :  { %343 = vmatpush.msrb.mxu1 %v176_v6  ;;  %409 = vmatpush.msra.mxu0 %v404_v7 }
  0x59   :  { %344 = vmatmul.f32.vlgmr.msrb.gmra.mxu1 %v93_v8 }
  0x5a   :  { %410 = vmatpush.msra.mxu0 %v403_v9  ;;  %450 = vmatpush.msra.mxu1 %v445_v24 }
  0x5c   :  { %411 = vmatpush.msra.mxu0 %v402_v10  ;;  %451 = vmatpush.msra.mxu1 %v444_v25 }
  0x5e   :  { %412 = vmatpush.msra.mxu0 %v401_v11  ;;  %452 = vmatpush.msra.mxu1 %v443_v26 }
  0x60   :  { %413 = vmatpush.msra.mxu0 %v400_v12  ;;  %453 = vmatpush.msra.mxu1 %v442_v27 }
  0x62   :  { %414 = vmatpush.msra.mxu0 %v399_v13  ;;  %454 = vmatpush.msra.mxu1 %v441_v28 }
  0x64   :  { %415 = vmatpush.msra.mxu0 %v398_v14  ;;  %455 = vmatpush.msra.mxu1 %v440_v30 }
  0x66   :  { %416 = vmatpush.msra.mxu0 %v397_v15  ;;  %456 = vmatpush.msra.mxu1 %v439_v31 }
  0x68   :  { %417 = vmatpush.msra.mxu0 %v396_v16  ;;  %457 = vmatpush.msra.mxu1 %v438_v34 }
  0x6a   :  { %418 = vmatpush.msra.mxu0 %v395_v17  ;;  %458 = vmatpush.msra.mxu1 %v437_v36 }
  0x6c   :  { %419 = vmatpush.msra.mxu0 %v394_v18  ;;  %459 = vmatpush.msra.mxu1 %v436_v39 }
  0x6e   :  { %420 = vmatpush.msra.mxu0 %v393_v19  ;;  %460 = vmatpush.msra.mxu1 %v435_v42 }
  0x70   :  { %421 = vmatpush.msra.mxu0 %v392_v20  ;;  %461 = vmatpush.msra.mxu1 %v434_v44 }
  0x72   :  { %422 = vmatpush.msra.mxu0 %v391_v21  ;;  %462 = vmatpush.msra.mxu1 %v433_v47 }
  0x74   :  { %423 = vmatpush.msra.mxu0 %v390_v22  ;;  %463 = vmatpush.msra.mxu1 %v432_v55 }
  0x76   :  { %424 = vmatpush.msra.mxu0 %v389_v23  ;;  %464 = vmatpush.msra.mxu1 %v431_v56 }
  0x78   :  { %465 = vmatpush.msra.mxu1 %v430_v57 }
  0xca   :  { %v245_v32 = vpop.f32.mrf.mxu0 }
  0xcb   :  { %v246_v33 = vadd.f32 %v497_v29, %v245_v32 }
  0xcd   :  { %v265_v35 = vpop.f32.mrf.mxu1 }
  0xce   :  { %v266_v37 = vadd.f32 %v265_v35, %v246_v33  ;;  %v285_v38 = vpop.f32.mrf.mxu2 }
  0xd0   :  { %v286_v40 = vadd.f32 %v285_v38, %v266_v37 }
  0xd1   :  { %v305_v41 = vpop.f32.mrf.mxu3 }
  0xd2   :  { %v306_v43 = vadd.f32 %v305_v41, %v286_v40 }
  0xd4   :  { %v325_v45 = vpop.f32.mrf.mxu0 }
  0xd5   :  { %v326_v46 = vadd.f32 %v325_v45, %v306_v43 }
  0xd6   :  { %v345_v48 = vpop.f32.mrf.mxu1 }
  0xd7   :  { %v346_v49 = vadd.f32 %v345_v48, %v326_v46 }
  0xd8   :  { %v365_v50 = vpop.f32.mrf.mxu2 }
  0xd9   :  { %v366_v51 = vadd.f32 %v365_v50, %v346_v49 }
  0xda   :  { %v385_v52 = vpop.f32.mrf.mxu3 }
  0xdb   :  { %v386_v53 = vadd.f32 %v385_v52, %v366_v51 }
  0xdd   :  { %v388_v54 = vmax.f32 %v386_v53, 0.0 }
  0xdf   :  { %425 = vmatmul.f32.vlgmr.msra.gmra.mxu0 %v388_v54 }
 0x15c   :  { %v426_v59 = vpop.f32.mrf.mxu0 }
 0x15d   :  { %v427_v60 = vadd.f32 %v498_v58, %v426_v59 }
 0x15f   :  { %v429_v61 = vmax.f32 %v427_v60, 0.0 }
 0x161   :  { %466 = vmatmul.f32.vlgmr.msra.gmra.mxu1 %v429_v61 }
 0x1de   :  { %v467_v63 = vpop.f32.mrf.mxu1 }
 0x1df   :  { %v468_v0 = vadd.f32 %v499_v62, %v467_v63 }
 0x1e1   :  { %470 = vst [vmem:[#allocation10] sm:$0xff] %v468_v0 }
 0x1e2   :  { %481 = dma.vmem_to_hbm [thread:$0]  %s477_s25, 128, %s479_s28, [#allocation4]  }
 0x1e3   :  { %626 = dma.done.wait [#allocation4], 128  }
 0x1e4   :  { %627 = vsyncadd [#allocation4], 4294967168 }
 0x1e5   :  { %486 = vsyncpa [#allocation3], 1 }
 0x1e6   :  { %487 = vsyncpa [#allocation6], 1 }
 0x1e7   :  { %488 = vsyncpa [#allocation9], 1 }
 0x1e8   :  { %489 = vsyncpa [#allocation4], 1 }

</bundles_post_ra>
